<compile_context>
chip_gen: v7x
topology: tpu7x:2x2x1
jax: 0.10.0
libtpu: 0.0.40
codegen_flags: <defaults>
</compile_context>

<pallas_src>
import functools
import math

import jax
import jax.numpy as jnp
import numpy as np
from jax.experimental import pallas as pl
from jax.experimental.pallas import tpu as pltpu

_SQRT2 = math.sqrt(2.0)            # folds 1/temperature (= 2) into both operands
_EPS = 1e-8                        # torch.nn.CosineSimilarity eps (norm clamp)
_VMEM_LIMIT = 32 * 1024 * 1024


def _embed_close_kernel(patches_ref, w_ref, b_ref, lat_ref,
                        emb_ref, close_ref, lat_s_ref):
    """Per (batch b, patch-tile i): embed + normalize patches, stream close-sum.

    patches_ref: (1, T, K)    w_ref: (K, Hid)    b_ref: (1, Hid)    lat_ref: (L, Hid)
    emb_ref:     (1, T, Hid)  out -- sqrt(2) * normalized patch embeddings
    close_ref:   (1, 1, 1)    out -- sum_{i,j} exp(2 * cos(patch_i, latent_j))
    lat_s_ref:   (L, Hid)     VMEM scratch -- sqrt(2) * normalized latents
    """
    i = pl.program_id(1)

    @pl.when(i == 0)
    def _init():
        # Once per batch (per core): normalize latent bank, zero the close acc.
        lat = lat_ref[...].astype(jnp.float32)
        lsq = jnp.sum(lat * lat, axis=-1, keepdims=True)
        lat_s = lat * (_SQRT2 * jax.lax.rsqrt(jnp.maximum(lsq, _EPS * _EPS)))
        lat_s_ref[...] = lat_s.astype(lat_s_ref.dtype)
        close_ref[...] = jnp.zeros_like(close_ref)

    # Patch embedding: the stride==kernel Conv2d is one MXU matmul (+ bias on tile).
    p = patches_ref[0]                                                # (T, K)
    e = jnp.dot(p, w_ref[...], preferred_element_type=jnp.float32)
    e = e + b_ref[...]                                                # (T, Hid) f32

    # Normalize once (EUP rsqrt), fold the temperature: e_s = sqrt(2) * e_hat.
    ssq = jnp.sum(e * e, axis=-1, keepdims=True)
    e_s = e * (_SQRT2 * jax.lax.rsqrt(jnp.maximum(ssq, _EPS * _EPS)))
    e_mxu = e_s.astype(emb_ref.dtype)
    emb_ref[0] = e_mxu

    # "close": (T, L) exponents = 2 * cos(patch, latent); streamed exp-sum.
    c = jax.lax.dot_general(e_mxu, lat_s_ref[...], (((1,), (1,)), ((), ())),
                            preferred_element_type=jnp.float32)
    close_ref[0] += jnp.sum(jnp.exp(c)).reshape(1, 1)


def _pair_far_kernel(emb_ref, close_ref, loss_ref, far_ref, *, tile, n_total):
    """Per (b, qi, ki): accumulate the exp-sum of one (T, T) similarity tile.

    emb_ref:   (1, N, Hid) resident per batch (sqrt(2)-scaled unit embeddings)
    close_ref: (1, 1, 1)   per-batch close exp-sum from kernel A
    loss_ref:  (1, 1, 1)   per-batch loss (written at the last tile)
    far_ref:   (1, 1)      VMEM scratch accumulator
    """
    qi = pl.program_id(1)
    ki = pl.program_id(2)

    @pl.when(jnp.logical_and(qi == 0, ki == 0))
    def _init():
        far_ref[...] = jnp.zeros_like(far_ref)

    q = emb_ref[0, pl.ds(pl.multiple_of(qi * tile, tile), tile), :]   # (T, Hid)
    k = emb_ref[0, pl.ds(pl.multiple_of(ki * tile, tile), tile), :]   # (T, Hid)
    # (T, T) exponents = 2 * cos(patch_q, patch_k); no per-element divide/scale left.
    s = jax.lax.dot_general(q, k, (((1,), (1,)), ((), ())),
                            preferred_element_type=jnp.float32)
    far_ref[...] += jnp.sum(jnp.exp(s)).reshape(1, 1)

    @pl.when(jnp.logical_and(qi == pl.num_programs(1) - 1,
                             ki == pl.num_programs(2) - 1))
    def _finalize():
        # Remove the diagonal (cos(x, x) == 1 -> exp(2) each) instead of masking.
        far_tot = far_ref[...] - float(n_total) * math.exp(2.0)       # (1, 1)
        # loss = -log(close/far) = log(far) - log(close)
        loss_ref[0] = jnp.log(far_tot) - jnp.log(close_ref[0])


def pair_contrastive_loss(x, conv_w, conv_b, latent, *, compute_dtype=jnp.float32):
    """x: (B, C, H, W) NCHW; conv_w: (Hid, C, ks, ks); conv_b: (Hid,);
    latent: (1, L, Hid).  Returns the scalar mean loss (float32).

    compute_dtype=jnp.bfloat16 halves HBM traffic and doubles MXU rate
    (accumulation stays float32); float32 matches the reference tightly.
    """
    B, C, H, W = x.shape
    hid, _, ks, _ = conv_w.shape
    Hs, Ws = H // ks, W // ks
    N, K = Hs * Ws, C * ks * ks
    L = latent.shape[1]

    # im2col glue: non-overlapping patches, (c, kh, kw) flattened to match conv weight.
    # TODO(synk): fuse this NCHW relayout into kernel A (strided BlockSpec / DMA
    # gather) to save one full HBM read+write of x before the kernel starts.
    patches = (x.reshape(B, C, Hs, ks, Ws, ks)
                 .transpose(0, 2, 4, 1, 3, 5)
                 .reshape(B, N, K)).astype(compute_dtype)
    w_mat = conv_w.reshape(hid, K).T.astype(compute_dtype)            # (K, Hid)
    b_mat = conv_b.reshape(1, hid).astype(jnp.float32)                # (1, Hid)
    lat = latent.reshape(L, hid).astype(compute_dtype)                # (L, Hid)

    # Lane/sublane-friendly tile along the patch axis; fall back to the full
    # (untiled) axis when N is not a multiple of 128 (e.g. the tiny demo below).
    T = 128 if N % 128 == 0 else N
    NT = N // T

    # ---- Kernel A: embed + normalize + close exp-sum, grid (B, N/T) ----
    emb_s, close_sum = pl.pallas_call(
        _embed_close_kernel,
        out_shape=(jax.ShapeDtypeStruct((B, N, hid), compute_dtype),
                   jax.ShapeDtypeStruct((B, 1, 1), jnp.float32)),
        grid_spec=pltpu.PrefetchScalarGridSpec(
            num_scalar_prefetch=0,
            grid=(B, NT),
            in_specs=[pl.BlockSpec((1, T, K), lambda b, i: (b, i, 0)),
                      pl.BlockSpec((K, hid), lambda b, i: (0, 0)),
                      pl.BlockSpec((1, hid), lambda b, i: (0, 0)),
                      pl.BlockSpec((L, hid), lambda b, i: (0, 0))],
            out_specs=[pl.BlockSpec((1, T, hid), lambda b, i: (b, i, 0)),
                       pl.BlockSpec((1, 1, 1), lambda b, i: (b, 0, 0))],
            scratch_shapes=[pltpu.VMEM((L, hid), compute_dtype)]),
        compiler_params=pltpu.CompilerParams(
            dimension_semantics=("parallel", "arbitrary"),
            vmem_limit_bytes=_VMEM_LIMIT),
    )(patches, w_mat, b_mat, lat)

    # ---- Kernel B: far exp-sum over (T, T) tiles + loss, grid (B, N/T, N/T) ----
    loss_b = pl.pallas_call(
        functools.partial(_pair_far_kernel, tile=T, n_total=N),
        out_shape=jax.ShapeDtypeStruct((B, 1, 1), jnp.float32),
        grid_spec=pltpu.PrefetchScalarGridSpec(
            num_scalar_prefetch=0,
            grid=(B, NT, NT),
            in_specs=[pl.BlockSpec((1, N, hid), lambda b, qi, ki: (b, 0, 0)),
                      pl.BlockSpec((1, 1, 1), lambda b, qi, ki: (b, 0, 0))],
            out_specs=pl.BlockSpec((1, 1, 1), lambda b, qi, ki: (b, 0, 0)),
            scratch_shapes=[pltpu.VMEM((1, 1), jnp.float32)]),
        compiler_params=pltpu.CompilerParams(
            dimension_semantics=("parallel", "arbitrary", "arbitrary"),
            vmem_limit_bytes=_VMEM_LIMIT),
    )(emb_s, close_sum)

    return jnp.mean(loss_b)


def _reference(x, conv_w, conv_b, latent):
    """Pure-JAX reference mirroring the PyTorch forward."""
    B, C, H, W = x.shape
    hid, _, ks, _ = conv_w.shape
    Hs, Ws = H // ks, W // ks
    patches = (x.reshape(B, C, Hs, ks, Ws, ks)
                 .transpose(0, 2, 4, 1, 3, 5)
                 .reshape(B, Hs * Ws, C * ks * ks))
    emb = jnp.einsum('bnk,hk->bnh', patches, conv_w.reshape(hid, -1),
                     precision=jax.lax.Precision.HIGHEST) + conv_b
    eps = 1e-8

    def cos(a, b):
        dot = jnp.sum(a * b, axis=-1)
        return dot / jnp.maximum(jnp.linalg.norm(a, axis=-1) *
                                 jnp.linalg.norm(b, axis=-1), eps)

    sim = cos(emb[:, :, None, :], emb[:, None, :, :])                 # (B, N, N)
    N = sim.shape[1]
    mask = ~jnp.eye(N, dtype=bool)
    far_sum = jnp.sum(jnp.where(mask[None], jnp.exp(sim / 0.5), 0.0), axis=(1, 2))
    close = cos(emb[:, :, None, :], latent[:, None, :, :])            # (B, N, L)
    close_sum = jnp.sum(jnp.exp(close / 0.5), axis=(1, 2))
    loss = -jnp.log(close_sum / far_sum)
    return jnp.mean(loss)


if __name__ == "__main__":
    # Small shapes consistent with the module (channel=4, hidden=32, patch size=8,
    # latent bank of 16 vectors, 16x16 input -> N = 4 patches).
    B, C, H, W = 2, 4, 16, 16
    size, hidden, L = 8, 32, 16

    key = jax.random.PRNGKey(0)
    kx, kw, kb, kl = jax.random.split(key, 4)
    x = jax.random.normal(kx, (B, C, H, W), jnp.float32)
    conv_w = jax.random.normal(kw, (hidden, C, size, size), jnp.float32) * 0.05
    conv_b = jax.random.normal(kb, (hidden,), jnp.float32) * 0.05
    latent = jax.random.normal(kl, (1, L, hidden), jnp.float32)

    ref = jax.block_until_ready(_reference(x, conv_w, conv_b, latent))

    # float32 path: tight numerical check against the torch-equivalent reference.
    loss_f32 = jax.block_until_ready(
        pair_contrastive_loss(x, conv_w, conv_b, latent))
    np.testing.assert_allclose(np.asarray(loss_f32), np.asarray(ref),
                               rtol=1e-4, atol=1e-4)

    # bf16-MXU path (halved HBM traffic, 2x MXU rate); loose tolerance.
    loss_bf16 = jax.block_until_ready(
        pair_contrastive_loss(x, conv_w, conv_b, latent,
                              compute_dtype=jnp.bfloat16))
    np.testing.assert_allclose(np.asarray(loss_bf16), np.asarray(ref),
                               rtol=1e-1, atol=1e-1)

    print("KERNEL_OK")
</pallas_src>

<mosaic_0001>
module attributes {stable_mosaic.version = 11 : i64} {
  func.func @_embed_close_kernel(%arg0: i32, %arg1: i32, %arg2: memref<1x4x256xf32, #tpu.memory_space<vmem>>, %arg3: memref<256x32xf32, #tpu.memory_space<vmem>>, %arg4: memref<1x32xf32, #tpu.memory_space<vmem>>, %arg5: memref<16x32xf32, #tpu.memory_space<vmem>>, %arg6: memref<1x4x32xf32, #tpu.memory_space<vmem>>, %arg7: memref<1x1x1xf32, #tpu.memory_space<vmem>>, %arg8: memref<16x32xf32, #tpu.memory_space<vmem>>) attributes {dimension_semantics = [#tpu.dimension_semantics<parallel>, #tpu.dimension_semantics<arbitrary>], iteration_bounds = array<i64: 2, 1>, scalar_prefetch = 0 : i64, scratch_operands = 1 : i64, tpu.core_type = #tpu.core_type<tc>, window_params = [{transform_indices = @transform_0, window_bounds = array<i64: 1, 4, 256>}, {pipeline_mode = #tpu.pipeline_mode<synchronous>, transform_indices = @transform_1, window_bounds = array<i64: 256, 32>}, {pipeline_mode = #tpu.pipeline_mode<synchronous>, transform_indices = @transform_2, window_bounds = array<i64: 1, 32>}, {pipeline_mode = #tpu.pipeline_mode<synchronous>, transform_indices = @transform_3, window_bounds = array<i64: 16, 32>}, {transform_indices = @transform_4, window_bounds = array<i64: 1, 4, 32>}, {transform_indices = @transform_5, window_bounds = array<i64: 1, 1, 1>}]} {
    %c0_i32 = arith.constant 0 : i32
    %0 = arith.cmpi eq, %arg1, %c0_i32 : i32
    %1 = arith.extui %0 : i1 to i32
    %c0_i32_0 = arith.constant 0 : i32
    %2 = arith.cmpi ne, %1, %c0_i32_0 : i32
    scf.if %2 {
      %c0_23 = arith.constant 0 : index
      %c0_24 = arith.constant 0 : index
      %37 = vector.load %arg5[%c0_23, %c0_24] : memref<16x32xf32, #tpu.memory_space<vmem>>, vector<16x32xf32>
      %38 = arith.mulf %37, %37 : vector<16x32xf32>
      %cst_25 = arith.constant dense<0.000000e+00> : vector<16xf32>
      %39 = vector.multi_reduction <add>, %38, %cst_25 [1] : vector<16x32xf32> to vector<16xf32>
      %40 = vector.shape_cast %39 : vector<16xf32> to vector<16x1xf32>
      %cst_26 = arith.constant 1.000000e-16 : f32
      %41 = vector.broadcast %cst_26 : f32 to vector<16x1xf32>
      %42 = arith.maximumf %40, %41 : vector<16x1xf32>
      %43 = math.rsqrt %42 : vector<16x1xf32>
      %cst_27 = arith.constant 1.41421354 : f32
      %44 = vector.broadcast %cst_27 : f32 to vector<16x1xf32>
      %45 = arith.mulf %44, %43 : vector<16x1xf32>
      %46 = vector.broadcast %45 : vector<16x1xf32> to vector<16x32xf32>
      %47 = arith.mulf %37, %46 : vector<16x32xf32>
      %c0_28 = arith.constant 0 : index
      %c0_29 = arith.constant 0 : index
      %48 = vector.load %arg8[%c0_28, %c0_29] : memref<16x32xf32, #tpu.memory_space<vmem>>, vector<16x32xf32>
      tpu.vector_store %arg8[%c0_28, %c0_29], %47 {strides = array<i32>} : memref<16x32xf32, #tpu.memory_space<vmem>>, vector<16x32xf32>,
      %cst_30 = arith.constant 0.000000e+00 : f32
      %49 = vector.broadcast %cst_30 : f32 to vector<1x1x1xf32>
      %c0_31 = arith.constant 0 : index
      %c0_32 = arith.constant 0 : index
      %c0_33 = arith.constant 0 : index
      %50 = vector.load %arg7[%c0_31, %c0_32, %c0_33] : memref<1x1x1xf32, #tpu.memory_space<vmem>>, vector<1x1x1xf32>
      tpu.vector_store %arg7[%c0_31, %c0_32, %c0_33], %49 {strides = array<i32>} : memref<1x1x1xf32, #tpu.memory_space<vmem>>, vector<1x1x1xf32>,
    } else {
    }
    %c0 = arith.constant 0 : index
    %c0_1 = arith.constant 0 : index
    %c0_2 = arith.constant 0 : index
    %3 = vector.load %arg2[%c0, %c0_1, %c0_2] : memref<1x4x256xf32, #tpu.memory_space<vmem>>, vector<1x4x256xf32>
    %4 = vector.shape_cast %3 : vector<1x4x256xf32> to vector<4x256xf32>
    %c0_3 = arith.constant 0 : index
    %c0_4 = arith.constant 0 : index
    %5 = vector.load %arg3[%c0_3, %c0_4] : memref<256x32xf32, #tpu.memory_space<vmem>>, vector<256x32xf32>
    %cst = arith.constant dense<0.000000e+00> : vector<4x32xf32>
    %6 = tpu.matmul %4, %5, %cst {dimension_numbers = #tpu.dot_dimension_numbers<[1], [0], [0], [1], [0, 0, 1, 1], [], []>} : vector<4x256xf32>, vector<256x32xf32>, vector<4x32xf32> -> vector<4x32xf32>
    %c0_5 = arith.constant 0 : index
    %c0_6 = arith.constant 0 : index
    %7 = vector.load %arg4[%c0_5, %c0_6] : memref<1x32xf32, #tpu.memory_space<vmem>>, vector<1x32xf32>
    %8 = vector.broadcast %7 : vector<1x32xf32> to vector<4x32xf32>
    %9 = arith.addf %6, %8 : vector<4x32xf32>
    %10 = arith.mulf %9, %9 : vector<4x32xf32>
    %cst_7 = arith.constant dense<0.000000e+00> : vector<4xf32>
    %11 = vector.multi_reduction <add>, %10, %cst_7 [1] : vector<4x32xf32> to vector<4xf32>
    %12 = vector.shape_cast %11 : vector<4xf32> to vector<4x1xf32>
    %cst_8 = arith.constant 1.000000e-16 : f32
    %13 = vector.broadcast %cst_8 : f32 to vector<4x1xf32>
    %14 = arith.maximumf %12, %13 : vector<4x1xf32>
    %15 = math.rsqrt %14 : vector<4x1xf32>
    %cst_9 = arith.constant 1.41421354 : f32
    %16 = vector.broadcast %cst_9 : f32 to vector<4x1xf32>
    %17 = arith.mulf %16, %15 : vector<4x1xf32>
    %18 = vector.broadcast %17 : vector<4x1xf32> to vector<4x32xf32>
    %19 = arith.mulf %9, %18 : vector<4x32xf32>
    %c0_10 = arith.constant 0 : index
    %c0_11 = arith.constant 0 : index
    %c0_12 = arith.constant 0 : index
    %20 = vector.load %arg6[%c0_10, %c0_11, %c0_12] : memref<1x4x32xf32, #tpu.memory_space<vmem>>, vector<1x4x32xf32>
    %21 = vector.shape_cast %20 : vector<1x4x32xf32> to vector<4x32xf32>
    %22 = vector.shape_cast %19 : vector<4x32xf32> to vector<1x4x32xf32>
    tpu.vector_store %arg6[%c0_10, %c0_11, %c0_12], %22 {strides = array<i32>} : memref<1x4x32xf32, #tpu.memory_space<vmem>>, vector<1x4x32xf32>,
    %c0_13 = arith.constant 0 : index
    %c0_14 = arith.constant 0 : index
    %23 = vector.load %arg8[%c0_13, %c0_14] : memref<16x32xf32, #tpu.memory_space<vmem>>, vector<16x32xf32>
    %cst_15 = arith.constant dense<0.000000e+00> : vector<4x16xf32>
    %24 = tpu.matmul %19, %23, %cst_15 {dimension_numbers = #tpu.dot_dimension_numbers<[1], [1], [0], [0], [0, 0, 1, 0], [], []>} : vector<4x32xf32>, vector<16x32xf32>, vector<4x16xf32> -> vector<4x16xf32>
    %c0_16 = arith.constant 0 : index
    %c0_17 = arith.constant 0 : index
    %c0_18 = arith.constant 0 : index
    %25 = vector.load %arg7[%c0_16, %c0_17, %c0_18] : memref<1x1x1xf32, #tpu.memory_space<vmem>>, vector<1x1x1xf32>
    %26 = vector.shape_cast %25 : vector<1x1x1xf32> to vector<1x1xf32>
    %27 = math.exp %24 : vector<4x16xf32>
    %28 = vector.shape_cast %27 : vector<4x16xf32> to vector<1x4x16xf32>
    %cst_19 = arith.constant dense<0.000000e+00> : vector<1xf32>
    %29 = vector.multi_reduction <add>, %28, %cst_19 [1, 2] : vector<1x4x16xf32> to vector<1xf32>
    %30 = vector.shape_cast %29 : vector<1xf32> to vector<1x1x1xf32>
    %31 = vector.extract %30[0, 0, 0] : f32 from vector<1x1x1xf32>
    %32 = vector.broadcast %31 : f32 to vector<1x1xf32>
    %33 = arith.addf %26, %32 : vector<1x1xf32>
    %c0_20 = arith.constant 0 : index
    %c0_21 = arith.constant 0 : index
    %c0_22 = arith.constant 0 : index
    %34 = vector.load %arg7[%c0_20, %c0_21, %c0_22] : memref<1x1x1xf32, #tpu.memory_space<vmem>>, vector<1x1x1xf32>
    %35 = vector.shape_cast %34 : vector<1x1x1xf32> to vector<1x1xf32>
    %36 = vector.shape_cast %33 : vector<1x1xf32> to vector<1x1x1xf32>
    tpu.vector_store %arg7[%c0_20, %c0_21, %c0_22], %36 {strides = array<i32>} : memref<1x1x1xf32, #tpu.memory_space<vmem>>, vector<1x1x1xf32>,
    return
  }
  func.func @transform_0(%arg0: i32, %arg1: i32) -> (i32, i32, i32) {
    %c0_i32 = arith.constant 0 : i32
    %c0_i32_0 = arith.constant 0 : i32
    return %arg0, %arg1, %c0_i32 : i32, i32, i32
  }
  func.func @transform_1(%arg0: i32, %arg1: i32) -> (i32, i32) {
    %c0_i32 = arith.constant 0 : i32
    %c0_i32_0 = arith.constant 0 : i32
    %c0_i32_1 = arith.constant 0 : i32
    return %c0_i32, %c0_i32_0 : i32, i32
  }
  func.func @transform_2(%arg0: i32, %arg1: i32) -> (i32, i32) {
    %c0_i32 = arith.constant 0 : i32
    %c0_i32_0 = arith.constant 0 : i32
    %c0_i32_1 = arith.constant 0 : i32
    return %c0_i32, %c0_i32_0 : i32, i32
  }
  func.func @transform_3(%arg0: i32, %arg1: i32) -> (i32, i32) {
    %c0_i32 = arith.constant 0 : i32
    %c0_i32_0 = arith.constant 0 : i32
    %c0_i32_1 = arith.constant 0 : i32
    return %c0_i32, %c0_i32_0 : i32, i32
  }
  func.func @transform_4(%arg0: i32, %arg1: i32) -> (i32, i32, i32) {
    %c0_i32 = arith.constant 0 : i32
    %c0_i32_0 = arith.constant 0 : i32
    return %arg0, %arg1, %c0_i32 : i32, i32, i32
  }
  func.func @transform_5(%arg0: i32, %arg1: i32) -> (i32, i32, i32) {
    %c0_i32 = arith.constant 0 : i32
    %c0_i32_0 = arith.constant 0 : i32
    %c0_i32_1 = arith.constant 0 : i32
    return %arg0, %c0_i32, %c0_i32_0 : i32, i32, i32
  }
}

</mosaic_0001>

<bundles_post_ra>
// kernel: tpu_custom_call.1
= control target key start
LH: loop header
LB: loop body
LE: loop exit
PB: predicated region body
PF: predicated region fallthrough
CT: control target
= control target key end

     0   :  { %11 = vsyncpa [#allocation4], 0  ;;  %s1142_s0 = inlined_call_operand.vmem [shape: f32[2,4,256], index: 0, kind: input, shape index: {}]   ;;  %s1143_s1 = inlined_call_operand.vmem [shape: f32[256,32], index: 1, kind: input, shape index: {}]   ;;  %s1144_s2 = inlined_call_operand.vmem [shape: f32[1,32], index: 2, kind: input, shape index: {}]   ;;  %s1145_s3 = inlined_call_operand.vmem [shape: f32[16,32], index: 3, kind: input, shape index: {}]   ;;  %s1146_s4 = inlined_call_operand.hbm [shape: f32[2,4,32], index: 4, kind: output, shape index: {0}]   ;;  %s1147_s5 = inlined_call_operand.vmem [shape: f32[2,1,1], index: 5, kind: output, shape index: {1}]  }
   0x1   :  { %13 = vsyncpa [#allocation4 + $0x1], 0  ;;  %s908_s18 = smov 0   ;;  %s910_s19 = smov 0  }
   0x2   :  { %s912_s20 = smov 0   ;;  %s914_s21 = smov 0  }
   0x3   :  { %s916_s22 = smov 0   ;;  %s918_s23 = smov 0  }
   0x4 LB: > { %s627_s24 = sadd.s32 4294967295, %s872_s23   ;;  %s628_s25 = sadd.s32 4294967294, %s872_s23   ;;  %s872_s23 = sphi %s918_s23, %s19_s23   ;;  %s868_s22 = sphi %s916_s22, %s1154_s22   ;;  %s864_s21 = sphi %s914_s21, %s1153_s21   ;;  %s860_s20 = sphi %s912_s20, %s1152_s20   ;;  %s856_s19 = sphi %s910_s19, %s1151_s19   ;;  %s852_s18 = sphi %s908_s18, %s1150_s18  }
   0x5   : > { %s31_s26 = sadd.s32 1, %s868_s22  ;;  %s131_s27 = sadd.s32 1, %s860_s20 }
   0x6   : > { %p33_p0 = scmp.ge.s32.totalorder %s31_s26, 2  ;;  %p141_p1 = scmp.ne.s32.totalorder %s860_s20, %s856_s19 }
   0x7   : > { %p142_p2 = scmp.eq.s32.totalorder %s627_s24, 1  ;;  %p147_p3 = scmp.ne.s32.totalorder %s856_s19, %s852_s18 }
   0x8   : > { %s1156_s26 = smov (%p33_p0, %s31_s26), 0  ;;  %p148_p5 = scmp.eq.s32.totalorder %s628_s25, 1 }
   0x9   : > { %p948_p4 = por %p142_p2, %p141_p1  ;;  %s126_s29 = ssub.s32 %s868_s22, %s1156_s26 }
   0xa   : > { %p631_p6 = scmp.ge.s32.totalorder %s872_s23, 1  ;;  %p129_p7 = scmp.eq.s32.totalorder %s126_s29, 0 }
   0xb   : > { %p955_p8 = por %p148_p5, %p147_p3  ;;  %p213_p9 = scmp.lt.s32.totalorder %s872_s23, 3 }
   0xc   : > { %s961_s6 = scalar_select %p129_p7, %s860_s20, %s131_s27  }
   0xd   : > { %p214_p10 = pnand %p631_p6, %p213_p9 }
   0xe   : > { %v304_v0 = vld [vmem:[%s1143_s1 + $0x80] sm:$0xff] (!%p214_p10)  ;;  %v305_v1 = vld [vmem:[%s1143_s1 + $0x88] sm:$0xff] (!%p214_p10)  ;;  %p248_p11 = scmp.lt.s32.totalorder (!%p214_p10), %s864_s21, 1  ;;  %v306_v5 = vld [vmem:[%s1143_s1 + $0x90] sm:$0xff] (!%p214_p10)  ;;  %vm268_vm0 = vcmask (!%p214_p10), 261120   ;;  %vm401_vm1 = vcmask (!%p214_p10), 257024  }
   0xf   : > { %217 = sbr.rel (%p214_p10) target bundleno = 862 (0x35e), region = 36  ;;  %v288_v2 = vld [vmem:[%s1143_s1] sm:$0xff] (!%p214_p10)  ;;  %v689_v3 = vpack.c.bf16 (!%p214_p10), %v305_v1, %v304_v0  ;;  %v289_v4 = vld [vmem:[%s1143_s1 + $0x8] sm:$0xff] (!%p214_p10)  ;;  %v307_v6 = vld [vmem:[%s1143_s1 + $0x98] sm:$0xff] (!%p214_p10)  ;;  %vm285_vm3 = vcmask (!%p214_p10), 0   ;;  %vm876_vm4 = vmmov (!%p214_p10), 0  }
  0x10   : > { %v691_v7 = vpack.c.bf16 (!%p214_p10), %v289_v4, %v288_v2  ;;  %v693_v8 = vpack.c.bf16 (!%p214_p10), %v307_v6, %v306_v5  ;;  %v290_v9 = vld [vmem:[%s1143_s1 + $0x10] sm:$0xff] (!%p214_p10)  ;;  %v291_v10 = vld [vmem:[%s1143_s1 + $0x18] sm:$0xff] (!%p214_p10)  ;;  %v308_v11 = vld [vmem:[%s1143_s1 + $0xa0] sm:$0xff] (!%p214_p10)  ;;  %s240_s15 = sand.u32 (!%p214_p10), 1, %s856_s19   ;;  %vm495_vm5 = vcmask (!%p214_p10), 125952   ;;  %s640_s17 = sshll.u32 (!%p214_p10), %s864_s21, 6 }
  0x11   : > { %690 = vmatprep.subr.bf16.mxu0 (!%p214_p10), %v689_v3  ;;  %v309_v12 = vld [vmem:[%s1143_s1 + $0xa8] sm:$0xff] (!%p214_p10)  ;;  %v695_v13 = vpack.c.bf16 (!%p214_p10), %v291_v10, %v290_v9  ;;  %v292_v15 = vld [vmem:[%s1143_s1 + $0x20] sm:$0xff] (!%p214_p10)  ;;  %v310_v17 = vld [vmem:[%s1143_s1 + $0xb0] sm:$0xff] (!%p214_p10)  ;;  %s632_s16 = sshll.u32 (!%p214_p10), %s240_s15, 2  ;;  %s1098_s27 = scalar_lea.hbm (!%p214_p10), %s1146_s4, %s640_s17 }
  0x12   : > { %692 = vmatpush3.bf16.msra.mxu0 (!%p214_p10), %v691_v7  ;;  %v697_v14 = vpack.c.bf16 (!%p214_p10), %v309_v12, %v308_v11  ;;  %v293_v16 = vld [vmem:[%s1143_s1 + $0x28] sm:$0xff] (!%p214_p10)  ;;  %v311_v18 = vld [vmem:[%s1143_s1 + $0xb8] sm:$0xff] (!%p214_p10)  ;;  %v294_v21 = vld [vmem:[%s1143_s1 + $0x30] sm:$0xff] (!%p214_p10)  ;;  %v874_v12 = vmov (!%p214_p10), 0.0|0.0   ;;  %s511_s29 = scalar_lea.sflag (!%p214_p10), [#allocation4], %s240_s15  ;;  %s877_s8 = smov (!%p214_p10), [#allocation3]  }
  0x13   : > { %694 = vmatprep.subr.bf16.mxu0 (!%p214_p10), %v693_v8  ;;  %v699_v19 = vpack.c.bf16 (!%p214_p10), %v293_v16, %v292_v15  ;;  %v701_v20 = vpack.c.bf16 (!%p214_p10), %v311_v18, %v310_v17  ;;  %v295_v22 = vld [vmem:[%s1143_s1 + $0x38] sm:$0xff] (!%p214_p10)  ;;  %v312_v23 = vld [vmem:[%s1143_s1 + $0xc0] sm:$0xff] (!%p214_p10)  ;;  %v313_v24 = vld [vmem:[%s1143_s1 + $0xc8] sm:$0xff] (!%p214_p10)  ;;  %721 = vmatprep.subr.bf16.mxu1 (!%p214_p10), %v874_v12  ;;  %s798_s11 = sshll.u32 (!%p214_p10), %s877_s8, 4  ;;  %s799_s11 = int_to_ptr.vmem [resolvable:$false] %s798_s11 }
  0x14   : > { %v264_v27 = vld [vmem:[%s1145_s3] sm:$0xff] (!%p214_p10)  ;;  %v265_v28 = vld [vmem:[%s1145_s3 + $0x8] sm:$0xff] (!%p214_p10)  ;;  %v703_v29 = vpack.c.bf16 (!%p214_p10), %v295_v22, %v294_v21  ;;  %v705_v32 = vpack.c.bf16 (!%p214_p10), %v313_v24, %v312_v23  ;;  %v314_v35 = vld [vmem:[%s1143_s1 + $0xd0] sm:$0xff] (!%p214_p10) }
  0x15   : > { %v266_v30 = vmul.f32 (!%p214_p10), %v264_v27, %v264_v27  ;;  %v267_v31 = vmul.f32 (!%p214_p10), %v265_v28, %v265_v28  ;;  %v296_v33 = vld [vmem:[%s1143_s1 + $0x40] sm:$0xff] (!%p214_p10)  ;;  %v297_v34 = vld [vmem:[%s1143_s1 + $0x48] sm:$0xff] (!%p214_p10)  ;;  %v315_v36 = vld [vmem:[%s1143_s1 + $0xd8] sm:$0xff] (!%p214_p10) }
  0x16   : > { %s992_s10 = scalar_select %p248_p11, %s864_s21, 1  ;;  %696 = vmatpush3.bf16.msra.mxu0 %v695_v13  ;;  %v707_v38 = vpack.c.bf16 %v297_v34, %v296_v33  ;;  %v709_v40 = vpack.c.bf16 %v315_v36, %v314_v35  ;;  %v298_v41 = vld [vmem:[%s1143_s1 + $0x50] sm:$0xff]  ;;  %v299_v42 = vld [vmem:[%s1143_s1 + $0x58] sm:$0xff]  ;;  %v316_v43 = vld [vmem:[%s1143_s1 + $0xe0] sm:$0xff]  ;;  %v875_v13 = vmov 0.0  }
  0x17   : > { %698 = vmatprep.subr.bf16.mxu0 %v697_v14  ;;  %v269_v37 = vsel %vm268_vm0, %v266_v30, 0.0  ;;  %v272_v39 = vsel %vm268_vm0, %v267_v31, 0.0  ;;  %v317_v44 = vld [vmem:[%s1143_s1 + $0xe8] sm:$0xff]  ;;  %v711_v45 = vpack.c.bf16 %v299_v42, %v298_v41  ;;  %v300_v47 = vld [vmem:[%s1143_s1 + $0x60] sm:$0xff]  ;;  %v318_v49 = vld [vmem:[%s1143_s1 + $0xf0] sm:$0xff]  ;;  %686 = vmatprep.mubr.msk.f32.mxu1 %vm876_vm4, %v875_v13 }
  0x18   : > { %s643_s13 = sshll.u32 %s992_s10, 3  ;;  %270 = vadd.xlane.f32.xlu0 %v269_v37  ;;  %v713_v46 = vpack.c.bf16 %v317_v44, %v316_v43  ;;  %v301_v48 = vld [vmem:[%s1143_s1 + $0x68] sm:$0xff]  ;;  %v319_v50 = vld [vmem:[%s1143_s1 + $0xf8] sm:$0xff]  ;;  %v302_v53 = vld [vmem:[%s1143_s1 + $0x70] sm:$0xff]  ;;  %s1087_s14 = scalar_lea.vmem %s1147_s5, %s992_s10 }
  0x19   : > { %s256_s9 = scalar_lea.vmem %s1142_s0, %s643_s13  ;;  %v715_v51 = vpack.c.bf16 %v301_v48, %v300_v47  ;;  %v717_v52 = vpack.c.bf16 %v319_v50, %v318_v49  ;;  %v303_v54 = vld [vmem:[%s1143_s1 + $0x78] sm:$0xff]  ;;  %v635_v3 = vld [vmem:[%s1144_s2] ss:$0 sm:$0xff]  ;;  %vm723_vm2 = vmpackc.low %vm268_vm0, %vm268_vm0  ;;  %286 = vst.msk [vmem:[%s1087_s14] sm:$0x1] %vm285_vm3, %v875_v13  ;;  %s242_s10 = scalar_lea.vmem [#allocation3], %s632_s16 }
  0x1a   : > { %v287_v25 = vld [vmem:[%s256_s9] sm:$0xff]  ;;  %700 = vmatpush3.bf16.msra.mxu0 %v699_v19  ;;  %v719_v55 = vpack.c.bf16 %v303_v54, %v302_v53  ;;  %s528_s24 = sshll.u32 %s242_s10, 4  ;;  %s800_s9 = scalar_lea.vmem %s799_s11, 128  ;;  %s529_s24 = int_to_ptr.vmem [resolvable:$true] %s528_s24 }
  0x1b   : > { %v328_v26 = vcombine.high %v287_v25, %v287_v25  ;;  %702 = vmatprep.subr.bf16.mxu0 %v701_v20  ;;  %s794_s7 = scalar_lea.vmem %s529_s24, 64  ;;  %p801_p1 = scmp.lt.s32.totalorder %s529_s24, %s799_s11 }
  0x1c   : > { %273 = vadd.xlane.f32.xlu0 %v272_v39  ;;  %p795_p12 = scmp.ne.s32.totalorder %s529_s24, %s794_s7  ;;  %p802_p2 = scmp.lt.s32.totalorder %s800_s9, %s794_s7 }
  0x1d   : > { %394 = vmatprep.mubr.f32.mxu0 %v328_v26 }
  0x1e   : > { %704 = vmatpush3.bf16.msra.mxu0 %v703_v29  ;;  %p796_p13 = pnand %p795_p12, %p948_p4  ;;  %p803_p3 = por %p802_p2, %p801_p1 }
  0x1f   : > { %706 = vmatprep.subr.bf16.mxu0 %v705_v32 }
  0x20   : > { %p797_p0 = pneg %p796_p13 }
  0x22   : > { %708 = vmatpush3.bf16.msra.mxu0 %v707_v38  ;;  %p804_p5 = pnand %p803_p3, %p797_p0 }
  0x23   : > { %710 = vmatprep.subr.bf16.mxu0 %v709_v40 }
  0x26   : > { %712 = vmatpush3.bf16.msra.mxu0 %v711_v45 }
  0x27   : > { %714 = vmatprep.subr.bf16.mxu0 %v713_v46 }
  0x2a   : > { %716 = vmatpush3.bf16.msra.mxu0 %v715_v51 }
  0x2b   : > { %718 = vmatprep.subr.bf16.mxu0 %v717_v52 }
  0x2e   : > { %720 = vmatpush3.bf16.msra.mxu0 %v719_v55 }
  0x31   : > { %395 = vmatmul.mubr.f32.vlgmr.msra.gmra.mrb[0].mxu0 %v287_v25 }
  0xa5   : > { %v271_v56 = vpop.xlane.xlu0 %270 }
  0xa6   : > { %v275_v57 = vmax.f32 %v271_v56, 1e-16 }
  0xa8   : > { %786 = vrsqrt.f32 %v275_v57 }
  0xa9   : > { %v274_v58 = vpop.xlane.xlu0 %273 }
  0xaa   : > { %v276_v59 = vmax.f32 %v274_v58, 1e-16 }
  0xac   : > { %788 = vrsqrt.f32 %v276_v59 }
  0xb2   : > { %v787_v60 = vpop.eup %786 }
  0xb3   : > { %v279_v61 = vmul.f32 1.4142135, %v787_v60 }
  0xb5   : > { %v281_v62 = vmul.f32 %v279_v61, %v264_v27 }
  0xb6   : > { %v789_v63 = vpop.eup %788 }
  0xb7   : > { %283 = vst.msk [vmem:[#allocation2] sm:$0xff] %vm268_vm0, %v281_v62  ;;  %v280_v0 = vmul.f32 1.4142135, %v789_v63 }
  0xb9   : > { %v282_v1 = vmul.f32 %v280_v0, %v265_v28 }
  0xbb   : > { %284 = vst.msk [vmem:[#allocation2 + $0x8] sm:$0xff] %vm268_vm0, %v282_v1 }
  0xbe   : > { %v410_v9 = vld [vmem:[#allocation2] sm:$0xff] }
  0xc2   : > { %v411_v10 = vld [vmem:[#allocation2 + $0x8] sm:$0xff] }
  0xc3   : > { %v722_v11 = vpack.c.bf16 %v411_v10, %v410_v9 }
  0xc5   : > { %724 = vmatpush3.bf16.xpose.msk.msra.mxu1 %vm723_vm2, %v722_v11 }
 0x104   : > { %v676_v2 = vpop.f32.mrb[0].mxu0 }
 0x105   : > { %v677_v4 = vpop.f32.mrb[1].mxu0 }
 0x106   : > { %v678_v5 = vadd.f32 %v677_v4, %v676_v2 }
 0x108   : > { %v397_v6 = vadd.f32 %v678_v5, %v635_v3 }
 0x10a   : > { %v400_v7 = vmul.f32 %v397_v6, %v397_v6 }
 0x10c   : > { %v402_v8 = vsel %vm401_vm1, %v400_v7, 0.0 }
 0x10d   : > { %403 = vadd.xlane.f32.xlu1 %v402_v8 }
 0x19a   : > { %v404_v14 = vpop.xlane.xlu1 %403 }
 0x19b   : > { %v405_v15 = vmax.f32 %v404_v14, 1e-16 }
 0x19d   : > { %790 = vrsqrt.f32 %v405_v15 }
 0x1a7   : > { %v791_v16 = vpop.eup %790 }
 0x1a8   : > { %v407_v17 = vmul.f32 1.4142135, %v791_v16 }
 0x1aa   : > { %v408_v18 = vmul.f32 %v407_v17, %v397_v6 }
 0x1ac   : > { %687 = vmatmul.mubr.msk.f32.vlgmr.msra.gmra.mrb[0].mxu1 %vm268_vm0, %v408_v18  ;;  %409 = vst.msk [vmem:[%s242_s10] sm:$0xf] %vm401_vm1, %v408_v18 }
 0x27f   : > { %v488_v19 = vpop.f32.mrb[0].mxu1 }
 0x280   : > { %v493_v20 = vmul.f32 1.442695, %v488_v19  ;;  %v688_v21 = vpop.f32.mrb[1].mxu1 }
 0x282   : > { %792 = vpow2.f32 %v493_v20 }
 0x28c   : > { %v793_v22 = vpop.eup %792 }
 0x28d   : > { %v496_v23 = vsel %vm495_vm5, %v793_v22, 0.0 }
 0x28e   : > { %497 = vadd.xlane.f32.xlu1 %v496_v23 }
 0x28f   : > { %807 = shalt.err (!%p804_p5)
}
 0x290   : > { %s808_s21 = scalar_lea.hbm %s1098_s27, 64  ;;  %s812_s16 = scalar_lea.hbm %s1146_s4, 128 }
 0x291   : > { %p809_p6 = scmp.ne.s32.totalorder %s1098_s27, %s808_s21  ;;  %p813_p10 = scmp.lt.u32.totalorder %s1098_s27, %s1146_s4 }
 0x292   : > { %p814_p11 = scmp.lt.u32.totalorder %s812_s16, %s808_s21  ;;  %p816_p13 = scmp.lt.u32.totalorder %s808_s21, %s1098_s27 }
 0x293   : > { %p810_p7 = pnand %p809_p6, %p948_p4 }
 0x294   : > { %p815_p12 = por %p814_p11, %p813_p10 }
 0x295   : > { %p811_p9 = pneg %p810_p7 }
 0x296   : > { %p817_p0 = por %p816_p13, %p815_p12 }
 0x298   : > { %p818_p1 = pnand %p817_p0, %p811_p9 }
 0x29a   : > { %821 = shalt.err (!%p818_p1)
}
 0x29b   : > { %727 = dma.vmem_to_hbm [thread:$0]  (%p948_p4), %s529_s24, 64, %s1098_s27, %s511_s29   ;;  %v492_v31 = vld [vmem:[%s1087_s14] sm:$0x1] }
 0x31b   : > { %v498_v24 = vpop.xlane.xlu1 %497 }
 0x31c   : > { %v499_v25 = vrot.slane %v498_v24, 4 }
 0x31e   : > { %v500_v26 = vadd.f32 %v499_v25, %v498_v24 }
 0x320   : > { %v501_v27 = vrot.slane %v500_v26, 2 }
 0x322   : > { %v502_v28 = vadd.f32 %v501_v27, %v500_v26 }
 0x324   : > { %v503_v29 = vrot.slane %v502_v28, 1 }
 0x326   : > { %v504_v30 = vadd.f32 %v503_v29, %v502_v28 }
 0x328   : > { %725 = vpush %v504_v30 }
 0x359   : > { %s726_s25 = spop %725 }
 0x35a   : > { %v506_v32 = vstv %s726_s25 }
 0x35b   : > { %v507_v33 = vadd.f32 %v506_v32, %v492_v31 }
 0x35d   : > { %509 = vst.msk [vmem:[%s1087_s14] sm:$0x1] %vm285_vm3, %v507_v33 }
 0x35e PF: > { %p733_p2 = scmp.ge.s32.totalorder %s872_s23, 2  ;;  %s543_s28 = sand.u32 1, %s852_s18  }
 0x35f   : > { %s544_s24 = scalar_lea.sflag [#allocation4], %s543_s28 }
 0x360   : > { %p730_p4 = pnand %p733_p2, %p955_p8 }
 0x362   : > { %847 = dma.done.wait (!%p730_p4), %s544_s24, 64  }
 0x363   : > { %849 = vsyncadd (!%p730_p4), %s544_s24, 4294967232  ;;  %s19_s23 = sadd.s32 1, %s872_s23   ;;  %s1150_s18 = smov %s856_s19 }
 0x364   : > { %p16_p3 = scmp.ge.s32.totalorder %s19_s23, 4   ;;  %s1151_s19 = smov %s860_s20 }
 0x365   : > { %s1152_s20 = smov %s961_s6  ;;  %s1153_s21 = smov %s868_s22 }
 0x366   : > { %s1154_s22 = smov %s1156_s26  ;;  %18 = sbr.rel (!%p16_p3) target bundleno = 4 (0x4), region = 87 }
 0x36d   :  { %555 = vsyncpa [#allocation4], 1 }
 0x36e   :  { %557 = vsyncpa [#allocation4 + $0x1], 1 }

</bundles_post_ra>
